<compile_context>
chip_gen: v7x
topology: tpu7x:2x2x1
jax: 0.10.0
libtpu: 0.0.40
codegen_flags: <defaults>
</compile_context>

<pallas_src>
import functools

import jax
import jax.numpy as jnp
from jax.experimental import pallas as pl
from jax.experimental.pallas import tpu as pltpu


# ----------------------------------------------------------------------------
# pltpu.roll direction probe (numpy convention: roll(x, s, axis)[t] == x[t-s]).
# ----------------------------------------------------------------------------
@functools.lru_cache(maxsize=None)
def _roll_is_numpy_style() -> bool:
    def probe(x_ref, o_ref):
        o_ref[...] = pltpu.roll(x_ref[...], shift=1, axis=0)

    x = jax.lax.broadcasted_iota(jnp.float32, (8, 128), 0)
    rolled = pl.pallas_call(
        probe, out_shape=jax.ShapeDtypeStruct((8, 128), jnp.float32)
    )(x)
    # numpy-style -> rolled[1, 0] == x[0, 0] == 0 ; opposite -> == 2
    return bool(float(rolled[1, 0]) < 0.5)


# ----------------------------------------------------------------------------
# Kernel
# ----------------------------------------------------------------------------
def _make_kernel(TL, numpy_roll):
    # Hillis-Steele doubling schedule (logical shift, effective rotate amount).
    steps = []
    s = 1
    while s < TL:
        steps.append((s, s if numpy_roll else (TL - s)))
        s *= 2

    def kernel(
        x_ref,        # (1, TL, D) input chunk
        h0_ref,       # (1, 1, D)  incoming hidden state (sequence start)
        gn1_ref,      # (1, D)     RMSNorm weight (sioconv)
        gn2_ref,      # (1, D)     RMSNorm weight (ffn)
        wz_ref, bz_ref,    # (D, D) f32 , (1, D)   fc_z
        wy_ref, by_ref,    # (D, D) bf16, (1, D)   fc_y
        wya_ref, bya_ref,  # (D, D) bf16, (1, D)   fc_y_act
        w1_ref, b1_ref,    # (D, F) bf16, (1, F)   ffn fc1
        w2_ref, b2_ref,    # (F, D) bf16, (1, D)   ffn fc2
        out_ref,      # (1, TL, D) block output
        hseq_ref,     # (1, TL, D) per-step hidden states
        hcarry,       # VMEM (1, D) f32 scratch: recurrence carry across chunks
    ):
        eps = jnp.float32(jnp.finfo(jnp.float32).eps)

        # Reset the recurrence carry at the start of every sequence.
        @pl.when(pl.program_id(1) == 0)
        def _():
            hcarry[...] = h0_ref[0].astype(jnp.float32)

        xo = x_ref[0].astype(jnp.float32)                        # (TL, D)

        # ---- RMSNorm (sioconv branch), f32 ----
        xn = xo * jax.lax.rsqrt(jnp.mean(xo * xo, axis=-1, keepdims=True) + eps)
        xn = xn * gn1_ref[0]

        # ---- fc_z in f32 (HIGHEST: keep f32 operands from bf16 demotion) ----
        zpre = jnp.dot(xn, wz_ref[...], preferred_element_type=jnp.float32,
                       precision=jax.lax.Precision.HIGHEST) + bz_ref[0]
        z = jax.nn.sigmoid(zpre)                                 # (TL, D)

        # ---- exp-free affine recurrence: h_t = a_t * h_{t-1} + b_t ----
        a = 1.0 - z
        b = z * xn
        row = jax.lax.broadcasted_iota(jnp.int32, (TL, 1), 0)
        # Fold the carried hidden state into row 0: b_0 <- b_0 + a_0 * h_carry.
        b = jnp.where(row == 0, b + a * hcarry[...], b)

        # Hillis-Steele inclusive scan over the time (sublane) axis:
        # log2(TL) steps of XLU roll + VPU select / multiply-add, zero exps.
        for sl, eff in steps:
            a_prev = pltpu.roll(a, shift=eff, axis=0)
            b_prev = pltpu.roll(b, shift=eff, axis=0)
            valid = row >= sl
            a_prev = jnp.where(valid, a_prev, jnp.float32(1.0))
            b_prev = jnp.where(valid, b_prev, jnp.float32(0.0))
            b = a * b_prev + b
            a = a * a_prev
        h_seq = b                                                # (TL, D)
        hcarry[...] = h_seq[TL - 1:TL, :]                        # carry forward

        # ---- output projections: bf16 x bf16 -> f32 on the MXU ----
        y = jnp.dot(h_seq.astype(wy_ref.dtype), wy_ref[...],
                    preferred_element_type=jnp.float32) + by_ref[0]
        g = jnp.dot(xn.astype(wya_ref.dtype), wya_ref[...],
                    preferred_element_type=jnp.float32) + bya_ref[0]
        y = y * (g * jax.nn.sigmoid(g))                          # * SiLU(fc_y_act)

        x1 = y + xo                                              # dropout == id (eval)

        # ---- RMSNorm (ffn branch) ----
        xn2 = x1 * jax.lax.rsqrt(jnp.mean(x1 * x1, axis=-1, keepdims=True) + eps)
        xn2 = xn2 * gn2_ref[0]

        # ---- MultiLRMLP (SiLU MLP; lr_scale/weight_decay are grad-hook only) ----
        hdn = jnp.dot(xn2.astype(w1_ref.dtype), w1_ref[...],
                      preferred_element_type=jnp.float32) + b1_ref[0]
        hdn = hdn * jax.nn.sigmoid(hdn)                          # SiLU
        ffn = jnp.dot(hdn.astype(w2_ref.dtype), w2_ref[...],
                      preferred_element_type=jnp.float32) + b2_ref[0]

        out_ref[0] = (ffn + x1).astype(out_ref.dtype)
        hseq_ref[0] = h_seq.astype(hseq_ref.dtype)

    return kernel


def _pick_chunk(L):
    # Prefer large chunks (fewer grid steps, bigger MXU M); 256 easily fits
    # VMEM at these D/F.  For production sizes cap by the VMEM accounting.
    for tl in (256, 128, 64, 32, 16, 8):
        if L % tl == 0:
            return tl
    return L


# ----------------------------------------------------------------------------
# Wrapper
# ----------------------------------------------------------------------------
def sioconv_multi_lr_block(x, hidden, params):
    """x: (B, L, D) f32, hidden: (B, D) f32 -> (out (B,L,D), hidden_seq (B,L,D))."""
    return _sioconv_impl(x, hidden, params, _roll_is_numpy_style())


@functools.partial(jax.jit, static_argnums=(3,))
def _sioconv_impl(x, hidden, params, numpy_roll):
    B, L, D = x.shape
    F = params["w1"].shape[1]

    TL = _pick_chunk(L)
    nchunks = L // TL
    hidden3 = hidden.reshape(B, 1, D)

    kernel = _make_kernel(TL, numpy_roll)

    def const_spec(shape):
        return pl.BlockSpec(shape, lambda b, c, _r=len(shape): (0,) * _r)

    in_specs = [
        pl.BlockSpec((1, TL, D), lambda b, c: (b, c, 0)),   # x chunk
        pl.BlockSpec((1, 1, D), lambda b, c: (b, 0, 0)),    # hidden (seq start)
        const_spec((1, D)),                                 # rmsnorm sioconv weight
        const_spec((1, D)),                                 # rmsnorm ffn weight
        const_spec((D, D)), const_spec((1, D)),             # fc_z
        const_spec((D, D)), const_spec((1, D)),             # fc_y
        const_spec((D, D)), const_spec((1, D)),             # fc_y_act
        const_spec((D, F)), const_spec((1, F)),             # ffn fc1
        const_spec((F, D)), const_spec((1, D)),             # ffn fc2
    ]
    out_specs = [
        pl.BlockSpec((1, TL, D), lambda b, c: (b, c, 0)),
        pl.BlockSpec((1, TL, D), lambda b, c: (b, c, 0)),
    ]
    out_shape = [
        jax.ShapeDtypeStruct((B, L, D), jnp.float32),
        jax.ShapeDtypeStruct((B, L, D), jnp.float32),
    ]

    grid_spec = pltpu.PrefetchScalarGridSpec(
        num_scalar_prefetch=0,
        grid=(B, nchunks),
        in_specs=in_specs,
        out_specs=out_specs,
        scratch_shapes=[pltpu.VMEM((1, D), jnp.float32)],   # recurrence carry
    )

    # ---- VMEM accounting (review item): blocks x buffer count + weights +
    #      in-kernel intermediates, 2x headroom, clamped to a v7x-safe range.
    const_bytes = sum(
        int(params[k].size) * params[k].dtype.itemsize
        for k in ("wz", "wy", "wya", "w1", "w2",
                  "bz", "by", "bya", "b1", "b2",
                  "g_norm_sioconv", "g_norm_ffn"))
    io_bytes = (2 * (TL * D * 4)            # x block, double-buffered
                + 2 * (D * 4)               # hidden block
                + 2 * 2 * (TL * D * 4)      # two f32 output blocks, double-buffered
                + 2 * const_bytes)          # constant-index weights (2 buffers)
    live_bytes = (12 * TL * D + 2 * TL * F) * 4 + D * 4
    vmem_limit = int(min(64 << 20, max(16 << 20, 2 * (io_bytes + live_bytes))))

    nsteps = max(1, TL.bit_length())        # ~log2(TL) scan steps
    flops = 2 * B * L * (3 * D * D + 2 * D * F) + 10 * B * L * D * nsteps
    transcendentals = B * L * (2 * D + F + 2)
    bytes_accessed = (3 * B * L * D + B * D) * 4 + const_bytes

    out, h_seq = pl.pallas_call(
        kernel,
        grid_spec=grid_spec,
        out_shape=out_shape,
        compiler_params=pltpu.CompilerParams(
            dimension_semantics=("parallel", "arbitrary"),
            vmem_limit_bytes=vmem_limit,
        ),
        cost_estimate=pl.CostEstimate(
            flops=flops,
            transcendentals=transcendentals,
            bytes_accessed=bytes_accessed,
        ),
    )(
        x, hidden3,
        params["g_norm_sioconv"].reshape(1, D),
        params["g_norm_ffn"].reshape(1, D),
        params["wz"], params["bz"].reshape(1, D),
        params["wy"], params["by"].reshape(1, D),
        params["wya"], params["bya"].reshape(1, D),
        params["w1"], params["b1"].reshape(1, F),
        params["w2"], params["b2"].reshape(1, D),
    )
    return out, h_seq


# ----------------------------------------------------------------------------
# Pure-JAX reference (sequential scan) mirroring the kernel's precision policy
# ----------------------------------------------------------------------------
def _reference(x, hidden, p):
    eps = float(jnp.finfo(jnp.float32).eps)

    def rmsnorm(v, g):
        return v * jax.lax.rsqrt(jnp.mean(v * v, -1, keepdims=True) + eps) * g

    def mm(a, w):
        return jnp.dot(a.astype(w.dtype), w, preferred_element_type=jnp.float32)

    xo = x
    xn = rmsnorm(xo, p["g_norm_sioconv"])
    z = jax.nn.sigmoid(
        jnp.dot(xn, p["wz"], preferred_element_type=jnp.float32,
                precision=jax.lax.Precision.HIGHEST) + p["bz"])

    def step(h, inp):
        z_t, x_t = inp
        h = z_t * x_t + (1.0 - z_t) * h
        return h, h

    _, hseq = jax.lax.scan(step, hidden,
                           (jnp.swapaxes(z, 0, 1), jnp.swapaxes(xn, 0, 1)))
    hseq = jnp.swapaxes(hseq, 0, 1)                          # (B, L, D)

    g = mm(xn, p["wya"]) + p["bya"]
    y = (mm(hseq, p["wy"]) + p["by"]) * (g * jax.nn.sigmoid(g))
    x1 = y + xo
    xn2 = rmsnorm(x1, p["g_norm_ffn"])
    h1 = mm(xn2, p["w1"]) + p["b1"]
    h1 = h1 * jax.nn.sigmoid(h1)
    out = mm(h1, p["w2"]) + p["b2"] + x1
    return out, hseq


def _init_params(key, dim, dim_ff_hidden, matmul_dtype=jnp.bfloat16):
    """PyTorch-Linear-style init; weights stored as (in, out).  Projection
    weights (fc_y, fc_y_act, fc1, fc2) use bf16 for the fast MXU path; fc_z
    stays f32 (it feeds the recurrence gate)."""
    ks = jax.random.split(key, 10)

    def linear(kw, kb, fan_in, fan_out, wdtype=jnp.float32):
        bound = 1.0 / (fan_in ** 0.5)
        w = jax.random.uniform(kw, (fan_in, fan_out), jnp.float32, -bound, bound)
        b = jax.random.uniform(kb, (fan_out,), jnp.float32, -bound, bound)
        return w.astype(wdtype), b

    wz, bz = linear(ks[0], ks[1], dim, dim)                          # f32
    wy, by = linear(ks[2], ks[3], dim, dim, matmul_dtype)
    wya, bya = linear(ks[4], ks[5], dim, dim, matmul_dtype)
    w1, b1 = linear(ks[6], ks[7], dim, dim_ff_hidden, matmul_dtype)
    w2, b2 = linear(ks[8], ks[9], dim_ff_hidden, dim, matmul_dtype)

    return {
        "wz": wz, "bz": bz,
        "wy": wy, "by": by,
        "wya": wya, "bya": bya,
        "w1": w1, "b1": b1,
        "w2": w2, "b2": b2,
        "g_norm_sioconv": jnp.ones((dim,), jnp.float32),
        "g_norm_ffn": jnp.ones((dim,), jnp.float32),
    }


if __name__ == "__main__":
    # Small but lane-aligned demo shapes: D, F multiples of 128; B=2 keeps both
    # v7x TensorCores busy via the "parallel" batch axis.
    B, L, D, F = 2, 256, 128, 256

    key = jax.random.PRNGKey(0)
    k_x, k_h, k_p = jax.random.split(key, 3)
    x = jax.random.normal(k_x, (B, L, D), jnp.float32)
    hidden = jax.random.normal(k_h, (B, D), jnp.float32)
    params = _init_params(k_p, D, F)

    out, h_seq = sioconv_multi_lr_block(x, hidden, params)
    out = jax.block_until_ready(out)
    h_seq = jax.block_until_ready(h_seq)

    ref_out, ref_h = _reference(x, hidden, params)
    # Hidden recurrence is f32 in both (parallel vs sequential association and
    # possible matmul-pass differences in fc_z -> modest tolerance).
    assert jnp.allclose(h_seq, ref_h, atol=5e-3, rtol=5e-3), "hidden mismatch"
    # Outputs go through bf16-weight matmuls (f32 accumulation).
    assert jnp.allclose(out, ref_out, atol=2e-2, rtol=2e-2), "output mismatch"

    print("KERNEL_OK")
</pallas_src>

<mosaic_0001>
module attributes {stable_mosaic.version = 11 : i64} {
  func.func @probe(%arg0: memref<8x128xf32, #tpu.memory_space<vmem>>, %arg1: memref<8x128xf32, #tpu.memory_space<vmem>>) attributes {dimension_semantics = [], scalar_prefetch = 0 : i64, scratch_operands = 0 : i64, tpu.core_type = #tpu.core_type<tc>} {
    %c0 = arith.constant 0 : index
    %c0_0 = arith.constant 0 : index
    %0 = vector.load %arg0[%c0, %c0_0] : memref<8x128xf32, #tpu.memory_space<vmem>>, vector<8x128xf32>
    %c1_i32 = arith.constant 1 : i32
    %1 = tpu.dynamic_rotate %0 by %c1_i32 dim 0 : vector<8x128xf32>, i32 -> vector<8x128xf32>
    %c0_1 = arith.constant 0 : index
    %c0_2 = arith.constant 0 : index
    %2 = vector.load %arg1[%c0_1, %c0_2] : memref<8x128xf32, #tpu.memory_space<vmem>>, vector<8x128xf32>
    tpu.vector_store %arg1[%c0_1, %c0_2], %1 {strides = array<i32>} : memref<8x128xf32, #tpu.memory_space<vmem>>, vector<8x128xf32>,
    return
  }
}

</mosaic_0001>

<bundles_post_ra>
// kernel: tpu_custom_call.1
= control target key start
LH: loop header
LB: loop body
LE: loop exit
PB: predicated region body
PF: predicated region fallthrough
CT: control target
= control target key end

     0   :  { %6 = vsyncpa [#allocation3], 0  ;;  %s125_s0 = inlined_call_operand.hbm [shape: f32[8,128], index: 0, kind: input, shape index: {}]   ;;  %s126_s1 = inlined_call_operand.hbm [shape: f32[8,128], index: 1, kind: output, shape index: {}]  }
   0x1   :  { %7 = vsyncpa [#allocation4], 0  ;;  %s89_s6 = smov [#allocation2]   ;;  %s41_s10 = scalar_lea.hbm %s125_s0, 128 }
   0x2   :  { %s14_s7 = sshll.u32 %s89_s6, 4  ;;  %p42_p0 = scmp.ne.s32.totalorder %s125_s0, %s41_s10  ;;  %s15_s7 = int_to_ptr.vmem [resolvable:$true] %s14_s7 }
   0x3   :  { %p45_p1 = scmp.lt.u32.totalorder %s41_s10, %s125_s0 }
   0x5   :  { %p47_p2 = pnand %p45_p1, %p42_p0 }
   0x7   :  { %50 = shalt.err (!%p47_p2)
}
   0x8   :  { %s51_s15 = scalar_lea.vmem %s15_s7, 128  ;;  %p56_p4 = scmp.lt.s32.totalorder %s15_s7, %s15_s7 }
   0x9   :  { %p52_p3 = scmp.ne.s32.totalorder %s15_s7, %s51_s15  ;;  %p57_p5 = scmp.lt.s32.totalorder %s51_s15, %s51_s15 }
   0xb   :  { %p58_p6 = por %p57_p5, %p56_p4 }
   0xd   :  { %p59_p7 = pnand %p58_p6, %p52_p3 }
   0xf   :  { %62 = shalt.err (!%p59_p7)
}
  0x10   :  { %17 = dma.hbm_to_vmem [thread:$0]  %s125_s0, 128, %s15_s7, [#allocation3]  }
  0x11   :  { %85 = dma.done.wait [#allocation3], 128  }
  0x12   :  { %86 = vsyncadd [#allocation3], 4294967168  ;;  %s90_s18 = smov [#allocation5]   ;;  %v21_v0 = vld [vmem:[#allocation2] sm:$0xff] }
  0x13   :  { %s30_s19 = sshll.u32 %s90_s18, 4  ;;  %v22_v1 = vrot.slane %v21_v0, 7  ;;  %s31_s19 = int_to_ptr.vmem [resolvable:$true] %s30_s19 }
  0x14   :  { %s63_s20 = scalar_lea.vmem %s31_s19, 128  ;;  %p68_p9 = scmp.lt.s32.totalorder %s31_s19, %s31_s19 }
  0x15   :  { %23 = vst [vmem:[#allocation5] sm:$0xff] %v22_v1  ;;  %p64_p8 = scmp.ne.s32.totalorder %s31_s19, %s63_s20  ;;  %p69_p10 = scmp.lt.s32.totalorder %s63_s20, %s63_s20 }
  0x17   :  { %p70_p11 = por %p69_p10, %p68_p9 }
  0x19   :  { %p71_p12 = pnand %p70_p11, %p64_p8 }
  0x1b   :  { %74 = shalt.err (!%p71_p12)
}
  0x1c   :  { %s75_s23 = scalar_lea.hbm %s126_s1, 128 }
  0x1d   :  { %p76_p13 = scmp.ne.s32.totalorder %s126_s1, %s75_s23  ;;  %p79_p0 = scmp.lt.u32.totalorder %s75_s23, %s126_s1 }
  0x1f   :  { %p81_p1 = pnand %p79_p0, %p76_p13 }
  0x21   :  { %84 = shalt.err (!%p81_p1)
}
  0x22   :  { %33 = dma.vmem_to_hbm [thread:$0]  %s31_s19, 128, %s126_s1, [#allocation4]  }
  0x23   :  { %87 = dma.done.wait [#allocation4], 128  }
  0x24   :  { %88 = vsyncadd [#allocation4], 4294967168 }
  0x25   :  { %37 = vsyncpa [#allocation3], 1 }
  0x26   :  { %38 = vsyncpa [#allocation4], 1 }

</bundles_post_ra>
